<compile_context>
chip_gen: v7x
topology: tpu7x:2x2x1
jax: 0.10.0
libtpu: 0.0.40
codegen_flags: <defaults>
</compile_context>

<pallas_src>
import jax
import jax.numpy as jnp
import numpy as np
from jax.experimental import pallas as pl
from jax.experimental.pallas import tpu as pltpu

B = 8            # batch; must equal HIDDEN for the torch broadcast to be valid
HIDDEN = 8       # hidden_dim
IN_DIMS = (16, 32)
LAST = len(IN_DIMS) - 1   # only the last modality survives the torch loop leak


def _log_softmax(x):
    m = jnp.max(x, axis=-1, keepdims=True)
    s = x - m
    return s - jnp.log(jnp.sum(jnp.exp(s), axis=-1, keepdims=True))


def iaff_kernel(e0_ref, e1_ref, w0p_ref, w1p_ref, bp_ref, out_ref):
    # Single packed projection: z = [ p1 | logits ]  (B, 2H), two MXU pushes.
    z = (jnp.dot(e0_ref[...], w0p_ref[...], preferred_element_type=jnp.float32)
         + jnp.dot(e1_ref[...], w1p_ref[...], preferred_element_type=jnp.float32)
         + bp_ref[...])
    p1 = z[:, :HIDDEN]                         # proj of last modality  (B, H)
    logits = z[:, HIDDEN:]                     # attention logits       (B, H)
    lsm = _log_softmax(logits)                 # (B, H) log-softmax att weights

    # torch: p1 * att_weights[:, LAST]  =>  a[b, h] = p1[b, h] * lsm[h, LAST]
    # Move column LAST of lsm (indexed by sublane) onto the lane axis using
    # VPU mask + XLU sublane-reduce only (no MXU matmul, no vxpose needed):
    col = lsm[:, LAST:LAST + 1]                                  # (B, 1)
    eye = (jax.lax.broadcasted_iota(jnp.int32, (B, HIDDEN), 0) ==
           jax.lax.broadcasted_iota(jnp.int32, (B, HIDDEN), 1)
           ).astype(jnp.float32)                                 # (B, H)
    v_row = jnp.sum(col * eye, axis=0, keepdims=True)            # (1, H): lsm[h, LAST]

    a = p1 * v_row                             # broadcast over batch rows
    a = _log_softmax(a)                        # LogSoftmax(dim=-1); dropout = id
    a = p1 * (1.0 + a)                         # fused: p + p * a
    # torch bug reproduced: only the LAST modality's att_embed is summed.
    out_ref[...] = jnp.sum(a, keepdims=True)   # (1, 1) scalar slab


def pack_iaff_params(params, in_dims=IN_DIMS, hidden=HIDDEN):
    """One-time packing (outside the hot path). Drops dead w0/b0."""
    w0, b0, w1, b1, wa, ba = params            # w0/b0 unused (loop-variable leak)
    del w0, b0
    wa0 = wa[:in_dims[0], :]
    wa1 = wa[in_dims[0]:, :]
    w0p = jnp.concatenate([jnp.zeros((in_dims[0], hidden), wa0.dtype), wa0], axis=1)
    w1p = jnp.concatenate([w1, wa1], axis=1)
    bp = jnp.concatenate([b1, ba], axis=1)
    return w0p, w1p, bp


def iaff_pallas(e0, e1, packed_params):
    assert B == HIDDEN, "torch broadcast (B,H)*(B,) requires hidden_dim == batch"
    w0p, w1p, bp = packed_params
    vmem = pl.BlockSpec(memory_space=pltpu.MemorySpace.VMEM)
    out = pl.pallas_call(
        iaff_kernel,
        out_shape=jax.ShapeDtypeStruct((1, 1), jnp.float32),
        in_specs=[vmem] * 5,
        out_specs=vmem,
    )(e0, e1, w0p, w1p, bp)
    return out[0, 0]


def iaff_reference(e0, e1, params):
    """Pure-JAX replica of the PyTorch forward (eval mode)."""
    w0, b0, w1, b1, wa, ba = params
    cat = jnp.concatenate([e0, e1], axis=-1)
    projs = [e0 @ w0 + b0[0], e1 @ w1 + b1[0]]
    lsm = jax.nn.log_softmax(cat @ wa + ba[0], axis=-1)
    a = None
    for i, p in enumerate(projs):
        a = p * lsm[:, i]            # numpy broadcast == torch broadcast (B == H)
        a = jax.nn.log_softmax(a, axis=-1)
        a = p * a
        a = p + a
    return jnp.sum(a)                # only last modality (loop-variable leak)


if __name__ == "__main__":
    key = jax.random.PRNGKey(0)
    ks = jax.random.split(key, 8)
    e0 = jax.random.normal(ks[0], (B, IN_DIMS[0]), jnp.float32)
    e1 = jax.random.normal(ks[1], (B, IN_DIMS[1]), jnp.float32)

    def linear_init(kw, kb, fan_in, fan_out):
        # deterministic init mimicking torch nn.Linear default (uniform +-1/sqrt(fan_in))
        bound = 1.0 / np.sqrt(fan_in)
        w = jax.random.uniform(kw, (fan_in, fan_out), jnp.float32, -bound, bound)
        b = jax.random.uniform(kb, (1, fan_out), jnp.float32, -bound, bound)
        return w, b

    w0, b0 = linear_init(ks[2], ks[3], IN_DIMS[0], HIDDEN)
    w1, b1 = linear_init(ks[4], ks[5], IN_DIMS[1], HIDDEN)
    wa, ba = linear_init(ks[6], ks[7], sum(IN_DIMS), HIDDEN)
    params = (w0, b0, w1, b1, wa, ba)

    packed = jax.tree_util.tree_map(jax.block_until_ready,
                                    pack_iaff_params(params))   # one-time packing

    out = jax.block_until_ready(iaff_pallas(e0, e1, packed))
    ref = jax.block_until_ready(iaff_reference(e0, e1, params))
    np.testing.assert_allclose(np.asarray(out), np.asarray(ref),
                               rtol=1e-4, atol=1e-5)
    print("KERNEL_OK")
</pallas_src>

<mosaic_0001>
module attributes {stable_mosaic.version = 11 : i64} {
  func.func @iaff_kernel(%arg0: memref<8x16xf32, #tpu.memory_space<vmem>>, %arg1: memref<8x32xf32, #tpu.memory_space<vmem>>, %arg2: memref<16x16xf32, #tpu.memory_space<vmem>>, %arg3: memref<32x16xf32, #tpu.memory_space<vmem>>, %arg4: memref<1x16xf32, #tpu.memory_space<vmem>>, %arg5: memref<1x1xf32, #tpu.memory_space<vmem>>) attributes {dimension_semantics = [], scalar_prefetch = 0 : i64, scratch_operands = 0 : i64, tpu.core_type = #tpu.core_type<tc>} {
    %c0 = arith.constant 0 : index
    %c0_0 = arith.constant 0 : index
    %0 = vector.load %arg0[%c0, %c0_0] : memref<8x16xf32, #tpu.memory_space<vmem>>, vector<8x16xf32>
    %c0_1 = arith.constant 0 : index
    %c0_2 = arith.constant 0 : index
    %1 = vector.load %arg2[%c0_1, %c0_2] : memref<16x16xf32, #tpu.memory_space<vmem>>, vector<16x16xf32>
    %cst = arith.constant dense<0.000000e+00> : vector<8x16xf32>
    %2 = tpu.matmul %0, %1, %cst {dimension_numbers = #tpu.dot_dimension_numbers<[1], [0], [0], [1], [0, 0, 1, 1], [], []>} : vector<8x16xf32>, vector<16x16xf32>, vector<8x16xf32> -> vector<8x16xf32>
    %c0_3 = arith.constant 0 : index
    %c0_4 = arith.constant 0 : index
    %3 = vector.load %arg1[%c0_3, %c0_4] : memref<8x32xf32, #tpu.memory_space<vmem>>, vector<8x32xf32>
    %c0_5 = arith.constant 0 : index
    %c0_6 = arith.constant 0 : index
    %4 = vector.load %arg3[%c0_5, %c0_6] : memref<32x16xf32, #tpu.memory_space<vmem>>, vector<32x16xf32>
    %cst_7 = arith.constant dense<0.000000e+00> : vector<8x16xf32>
    %5 = tpu.matmul %3, %4, %cst_7 {dimension_numbers = #tpu.dot_dimension_numbers<[1], [0], [0], [1], [0, 0, 1, 1], [], []>} : vector<8x32xf32>, vector<32x16xf32>, vector<8x16xf32> -> vector<8x16xf32>
    %6 = arith.addf %2, %5 : vector<8x16xf32>
    %c0_8 = arith.constant 0 : index
    %c0_9 = arith.constant 0 : index
    %7 = vector.load %arg4[%c0_8, %c0_9] : memref<1x16xf32, #tpu.memory_space<vmem>>, vector<1x16xf32>
    %8 = vector.broadcast %7 : vector<1x16xf32> to vector<8x16xf32>
    %9 = arith.addf %6, %8 : vector<8x16xf32>
    %10 = vector.extract_strided_slice %9 {offsets = [0, 0], sizes = [8, 8], strides = [1, 1]} : vector<8x16xf32> to vector<8x8xf32>
    %11 = vector.extract_strided_slice %9 {offsets = [0, 8], sizes = [8, 8], strides = [1, 1]} : vector<8x16xf32> to vector<8x8xf32>
    %cst_10 = arith.constant dense<0xFF800000> : vector<8xf32>
    %12 = vector.multi_reduction <maximumf>, %11, %cst_10 [1] : vector<8x8xf32> to vector<8xf32>
    %13 = vector.shape_cast %12 : vector<8xf32> to vector<8x1xf32>
    %14 = vector.broadcast %13 : vector<8x1xf32> to vector<8x8xf32>
    %15 = arith.subf %11, %14 : vector<8x8xf32>
    %16 = math.exp %15 : vector<8x8xf32>
    %cst_11 = arith.constant dense<0.000000e+00> : vector<8xf32>
    %17 = vector.multi_reduction <add>, %16, %cst_11 [1] : vector<8x8xf32> to vector<8xf32>
    %18 = vector.shape_cast %17 : vector<8xf32> to vector<8x1xf32>
    %19 = math.log %18 : vector<8x1xf32>
    %20 = vector.broadcast %19 : vector<8x1xf32> to vector<8x8xf32>
    %21 = arith.subf %15, %20 : vector<8x8xf32>
    %22 = vector.extract_strided_slice %21 {offsets = [0, 1], sizes = [8, 1], strides = [1, 1]} : vector<8x8xf32> to vector<8x1xf32>
    %23 = tpu.iota {dimensions = array<i32: 0>} : vector<8x8xi32>
    %24 = tpu.iota {dimensions = array<i32: 1>} : vector<8x8xi32>
    %25 = arith.cmpi eq, %23, %24 : vector<8x8xi32>
    %26 = arith.extui %25 : vector<8x8xi1> to vector<8x8xi32>
    %27 = arith.sitofp %26 : vector<8x8xi32> to vector<8x8xf32>
    %28 = vector.broadcast %22 : vector<8x1xf32> to vector<8x8xf32>
    %29 = arith.mulf %28, %27 : vector<8x8xf32>
    %cst_12 = arith.constant dense<0.000000e+00> : vector<8xf32>
    %30 = vector.multi_reduction <add>, %29, %cst_12 [0] : vector<8x8xf32> to vector<8xf32>
    %31 = vector.shape_cast %30 : vector<8xf32> to vector<1x8xf32>
    %32 = vector.broadcast %31 : vector<1x8xf32> to vector<8x8xf32>
    %33 = arith.mulf %10, %32 : vector<8x8xf32>
    %cst_13 = arith.constant dense<0xFF800000> : vector<8xf32>
    %34 = vector.multi_reduction <maximumf>, %33, %cst_13 [1] : vector<8x8xf32> to vector<8xf32>
    %35 = vector.shape_cast %34 : vector<8xf32> to vector<8x1xf32>
    %36 = vector.broadcast %35 : vector<8x1xf32> to vector<8x8xf32>
    %37 = arith.subf %33, %36 : vector<8x8xf32>
    %38 = math.exp %37 : vector<8x8xf32>
    %cst_14 = arith.constant dense<0.000000e+00> : vector<8xf32>
    %39 = vector.multi_reduction <add>, %38, %cst_14 [1] : vector<8x8xf32> to vector<8xf32>
    %40 = vector.shape_cast %39 : vector<8xf32> to vector<8x1xf32>
    %41 = math.log %40 : vector<8x1xf32>
    %42 = vector.broadcast %41 : vector<8x1xf32> to vector<8x8xf32>
    %43 = arith.subf %37, %42 : vector<8x8xf32>
    %cst_15 = arith.constant 1.000000e+00 : f32
    %44 = vector.broadcast %cst_15 : f32 to vector<8x8xf32>
    %45 = arith.addf %44, %43 : vector<8x8xf32>
    %46 = arith.mulf %10, %45 : vector<8x8xf32>
    %47 = vector.shape_cast %46 : vector<8x8xf32> to vector<1x8x8xf32>
    %cst_16 = arith.constant dense<0.000000e+00> : vector<1xf32>
    %48 = vector.multi_reduction <add>, %47, %cst_16 [1, 2] : vector<1x8x8xf32> to vector<1xf32>
    %49 = vector.shape_cast %48 : vector<1xf32> to vector<1x1x1xf32>
    %50 = vector.extract %49[0, 0, 0] : f32 from vector<1x1x1xf32>
    %51 = vector.broadcast %50 : f32 to vector<1x1xf32>
    %c0_17 = arith.constant 0 : index
    %c0_18 = arith.constant 0 : index
    %52 = vector.load %arg5[%c0_17, %c0_18] : memref<1x1xf32, #tpu.memory_space<vmem>>, vector<1x1xf32>
    tpu.vector_store %arg5[%c0_17, %c0_18], %51 {strides = array<i32>} : memref<1x1xf32, #tpu.memory_space<vmem>>, vector<1x1xf32>,
    return
  }
}

</mosaic_0001>

<bundles_post_ra>
// kernel: tpu_custom_call.1
= control target key start
LH: loop header
LB: loop body
LE: loop exit
PB: predicated region body
PF: predicated region fallthrough
CT: control target
= control target key end

     0   :  { %v346_v3 = vmov 0.0|0.0   ;;  %vm347_vm0 = vmmov 0   ;;  %v348_v9 = vmov 0.0   ;;  %s426_s0 = inlined_call_operand.vmem [shape: f32[8,16], index: 0, kind: input, shape index: {}]   ;;  %s427_s1 = inlined_call_operand.vmem [shape: f32[8,32], index: 1, kind: input, shape index: {}]   ;;  %s428_s2 = inlined_call_operand.vmem [shape: f32[16,16], index: 2, kind: input, shape index: {}]   ;;  %s429_s3 = inlined_call_operand.vmem [shape: f32[32,16], index: 3, kind: input, shape index: {}]   ;;  %s430_s4 = inlined_call_operand.vmem [shape: f32[1,16], index: 4, kind: input, shape index: {}]   ;;  %s431_s5 = inlined_call_operand.hbm [shape: f32[1,1], index: 5, kind: output, shape index: {}]  }
   0x1   :  { %v25_v0 = vld [vmem:[%s429_s3] sm:$0xff]  ;;  %v26_v1 = vld [vmem:[%s429_s3 + $0x8] sm:$0xff]  ;;  %295 = vmatprep.subr.bf16.mxu0 %v346_v3  ;;  %301 = vmatprep.subr.bf16.mxu1 %v346_v3  ;;  %v27_v6 = vld [vmem:[%s429_s3 + $0x10] sm:$0xff] }
   0x2   :  { %v22_v2 = vld [vmem:[%s428_s2] sm:$0xff]  ;;  %v296_v4 = vpack.c.bf16 %v26_v1, %v25_v0  ;;  %v23_v5 = vld [vmem:[%s428_s2 + $0x8] sm:$0xff]  ;;  %v28_v7 = vld [vmem:[%s429_s3 + $0x18] sm:$0xff]  ;;  %292 = vmatprep.mubr.msk.f32.mxu1 %vm347_vm0, %v348_v9  ;;  %285 = vmatprep.mubr.msk.f32.mxu0 %vm347_vm0, %v348_v9 }
   0x3   :  { %v302_v8 = vpack.c.bf16 %v23_v5, %v22_v2 }
   0x4   :  { %10 = vsyncpa [#allocation3], 0  ;;  %297 = vmatpush3.bf16.msra.mxu0 %v296_v4  ;;  %v299_v10 = vpack.c.bf16 %v28_v7, %v27_v6  ;;  %v21_v11 = vld [vmem:[%s426_s0] sm:$0xff]  ;;  %vm103_vm1 = vcmask 130048   ;;  %vm29_vm2 = vcmask 261120   ;;  %vm185_vm3 = vcmask 130112  }
   0x5   :  { %298 = vmatprep.subr.bf16.mxu0 %v346_v3  ;;  %303 = vmatpush3.bf16.msra.mxu1 %v302_v8  ;;  %v24_v12 = vld [vmem:[%s427_s1] sm:$0xff]  ;;  %s349_s0 = smov 120   ;;  %vm196_vm4 = vcmask 64512   ;;  %v350_v27 = vmov 9   ;;  %v203_v32 = vlaneseq  ;;  %s351_s1 = smov [#allocation2]   ;;  %vm249_vm6 = vcmask 0  }
   0x6   :  { %v267_v16 = vld [vmem:[%s430_s4] ss:$0 sm:$0xff]  ;;  %312 = vset.pattern.permute.xlu1 %v350_v27  ;;  %313 = vset.pattern.permute.xlu0 %v350_v27  ;;  %s257_s4 = sshll.u32 %s351_s1, 4  ;;  %s258_s4 = int_to_ptr.vmem [resolvable:$true] %s257_s4 }
   0x7   :  { %v204_v33 = vshrl.u32 %v203_v32, 7  ;;  %v206_v34 = vand.u32 127, %v203_v32  ;;  %s322_s10 = scalar_lea.vmem %s258_s4, 16  ;;  %s326_s11 = scalar_lea.vmem %s258_s4, 32 }
   0x8   :  { %300 = vmatpush3.bf16.msra.mxu0 %v299_v10  ;;  %293 = vmatmul.mubr.msk.f32.vlgmr.msra.gmra.mrb[0].mxu1 %vm103_vm1, %v21_v11  ;;  %p323_p0 = scmp.ne.s32.totalorder %s258_s4, %s322_s10  ;;  %p327_p1 = scmp.lt.s32.totalorder %s258_s4, %s258_s4 }
   0x9   :  { %vm207_vm5 = vcmp.eq.s32.totalorder %v204_v33, %v206_v34  ;;  %p328_p2 = scmp.lt.s32.totalorder %s326_s11, %s322_s10 }
   0xa   :  { %v268_v35 = vsel %vm207_vm5, 1.0, %v348_v9 }
   0xb   :  { %286 = vmatmul.mubr.msk.f32.vlgmr.msra.gmra.mrb[0].mxu0 %vm29_vm2, %v24_v12  ;;  %p329_p3 = por %p328_p2, %p327_p1 }
   0xd   :  { %p330_p4 = pnand %p329_p3, %p323_p0 }
  0xdb   :  { %v173_v13 = vpop.f32.mrb[0].mxu1 }
  0xdc   :  { %v294_v14 = vpop.f32.mrb[1].mxu1 }
  0xde   :  { %v99_v15 = vpop.f32.mrb[0].mxu0 }
  0xdf   :  { %v174_v17 = vadd.f32 %v173_v13, %v99_v15  ;;  %v287_v18 = vpop.f32.mrb[1].mxu0 }
  0xe1   :  { %v184_v19 = vadd.f32 %v267_v16, %v174_v17 }
  0xe3   :  { %v186_v20 = vsel %vm185_vm3, %v184_v19, -inf }
  0xe4   :  { %187 = vmax.xlane.f32.xlu0 %v186_v20 }
 0x171   :  { %v188_v21 = vpop.xlane.xlu0 %187 }
 0x172   :  { %v189_v22 = vsub.f32 %v184_v19, %v188_v21 }
 0x174   :  { %v190_v23 = vmul.f32 1.442695, %v189_v22 }
 0x176   :  { %314 = vpow2.f32 %v190_v23 }
 0x180   :  { %v315_v24 = vpop.eup %314 }
 0x181   :  { %193 = vrot.lane.b32.xlu0 %v315_v24, %s349_s0 }
 0x1f3   :  { %v194_v25 = vpop.permute.xlu0 %193 }
 0x1f4   :  { %v197_v26 = vsel %vm196_vm4, %v194_v25, 0.0 }
 0x1f5   :  { %198 = vadd.xlane.f32.xlu1 %v197_v26 }
 0x282   :  { %v199_v28 = vpop.xlane.xlu1 %198 }
 0x283   :  { %316 = vlog2.f32 %v199_v28 }
 0x28d   :  { %v317_v29 = vpop.eup %316 }
 0x28e   :  { %v201_v30 = vmul.f32 0.6931472, %v317_v29 }
 0x290   :  { %v202_v31 = vsub.f32 %v189_v22, %v201_v30 }
 0x292   :  { %212 = vperm.xlu1 %312, %v202_v31  }
 0x311   :  { %v213_v36 = vpop.permute.xlu1 %212 }
 0x312   :  { %v215_v37 = vmul.f32 %v268_v35, %v213_v36 }
 0x314   :  { %v216_v38 = vsel %vm196_vm4, %v215_v37, 0.0 }
 0x315   :  { %v217_v39 = vrot.slane %v216_v38, 4 }
 0x317   :  { %v218_v40 = vadd.f32 %v217_v39, %v216_v38 }
 0x319   :  { %v219_v41 = vrot.slane %v218_v40, 2 }
 0x31b   :  { %v220_v42 = vadd.f32 %v219_v41, %v218_v40 }
 0x31d   :  { %v221_v43 = vrot.slane %v220_v42, 1 }
 0x31f   :  { %v222_v44 = vadd.f32 %v221_v43, %v220_v42 }
 0x321   :  { %v223_v45 = vmul.f32 %v222_v44, %v184_v19 }
 0x323   :  { %v224_v46 = vsel %vm196_vm4, %v223_v45, -inf }
 0x324   :  { %225 = vmax.xlane.f32.xlu1 %v224_v46 }
 0x3b1   :  { %v226_v47 = vpop.xlane.xlu1 %225 }
 0x3b2   :  { %v227_v48 = vsub.f32 %v223_v45, %v226_v47 }
 0x3b4   :  { %v228_v49 = vmul.f32 1.442695, %v227_v48 }
 0x3b6   :  { %318 = vpow2.f32 %v228_v49 }
 0x3c0   :  { %v319_v50 = vpop.eup %318 }
 0x3c1   :  { %v230_v51 = vsel %vm196_vm4, %v319_v50, 0.0 }
 0x3c2   :  { %231 = vadd.xlane.f32.xlu0 %v230_v51 }
 0x44f   :  { %v232_v52 = vpop.xlane.xlu0 %231 }
 0x450   :  { %320 = vlog2.f32 %v232_v52 }
 0x45a   :  { %v321_v53 = vpop.eup %320 }
 0x45b   :  { %v234_v54 = vmul.f32 0.6931472, %v321_v53 }
 0x45d   :  { %v235_v55 = vsub.f32 %v227_v48, %v234_v54 }
 0x45f   :  { %v236_v56 = vadd.f32 1.0, %v235_v55 }
 0x461   :  { %v237_v57 = vmul.f32 %v236_v56, %v184_v19 }
 0x463   :  { %v238_v58 = vsel %vm196_vm4, %v237_v57, 0.0 }
 0x464   :  { %239 = vadd.xlane.f32.xlu0 %v238_v58 }
 0x4f1   :  { %v240_v59 = vpop.xlane.xlu0 %239 }
 0x4f2   :  { %v241_v60 = vrot.slane %v240_v59, 4 }
 0x4f4   :  { %v242_v61 = vadd.f32 %v241_v60, %v240_v59 }
 0x4f6   :  { %v243_v62 = vrot.slane %v242_v61, 2 }
 0x4f8   :  { %v244_v63 = vadd.f32 %v243_v62, %v242_v61 }
 0x4fa   :  { %v245_v0 = vrot.slane %v244_v63, 1 }
 0x4fc   :  { %v246_v1 = vadd.f32 %v245_v0, %v244_v63 }
 0x4fe   :  { %304 = vpush %v246_v1 }
 0x52f   :  { %s305_s9 = spop %304 }
 0x530   :  { %v248_v2 = vstv %s305_s9 }
 0x531   :  { %250 = vst.msk [vmem:[#allocation2] sm:$0x1] %vm249_vm6, %v248_v2 }
 0x532   :  { %333 = shalt.err (!%p330_p4)
}
 0x533   :  { %s334_s14 = scalar_lea.hbm %s431_s5, 16 }
 0x534   :  { %p335_p5 = scmp.ne.s32.totalorder %s431_s5, %s334_s14  ;;  %p338_p6 = scmp.lt.u32.totalorder %s334_s14, %s431_s5 }
 0x536   :  { %p340_p7 = pnand %p338_p6, %p335_p5 }
 0x538   :  { %343 = shalt.err (!%p340_p7)
}
 0x539   :  { %260 = dma.vmem_to_hbm [thread:$0]  %s258_s4, 16, %s431_s5, [#allocation3]  }
 0x53a   :  { %344 = dma.done.wait [#allocation3], 16  }
 0x53b   :  { %345 = vsyncadd [#allocation3], 4294967280 }
 0x53c   :  { %264 = vsyncpa [#allocation3], 1 }

</bundles_post_ra>
